<compile_context>
chip_gen: v5e
topology: v5e:2x2
jax: 0.10.0
libtpu: 0.0.40
codegen_flags: <defaults>
</compile_context>

<pallas_src>
import functools

import numpy as np
import jax
import jax.numpy as jnp
from jax.experimental import pallas as pl
from jax.experimental.pallas import tpu as pltpu

LANE = 128
SUBLANE = 8


def _round_up(n, m):
    return (n + m - 1) // m * m


# ---------------------------------------------------------------------------
# Recurrent Pallas kernel: one grid step per timestep, weights + h VMEM-resident.
# ---------------------------------------------------------------------------
def _gru_seq_kernel(px_ref, h0_ref, wh_ref, bh_ref, out_ref, h_scr, *, fh_pad, fh_k):
    t = pl.program_id(0)

    @pl.when(t == 0)
    def _():
        h_scr[...] = h0_ref[...]          # padded h0 -> VMEM carry (zeros in padded lanes)

    h = h_scr[...]                        # (B, Fh_pad)
    px = px_ref[0]                        # (B, 3*Fh_pad)  x-path preactivations (bias folded in)

    # Single fused MXU matmul on the recurrent path; K is only sublane-rounded (no 128 padding).
    ph = jnp.dot(h[:, :fh_k], wh_ref[...],
                 preferred_element_type=jnp.float32) + bh_ref[...]   # (B, 3*Fh_pad)

    P = fh_pad  # 128-lane aligned static gate slices
    r = jax.nn.sigmoid(px[:, 0:P] + ph[:, 0:P])
    z = jax.nn.sigmoid(px[:, P:2 * P] + ph[:, P:2 * P])
    # r gates the full h-path candidate term (bias included), exactly as in the module.
    n = jnp.tanh(px[:, 2 * P:3 * P] + r * ph[:, 2 * P:3 * P])
    h_new = (1.0 - z) * n + z * h

    h_scr[...] = h_new                    # carry to next timestep
    out_ref[0] = h_new                    # lane-dense (B, Fh_pad) unmasked store


# ---------------------------------------------------------------------------
# Parameter packing (plain-JAX setup glue, done once).
# ---------------------------------------------------------------------------
def pack_gru_params(params, fin, fh):
    """Fuse the six BasisLinear (W, b) pairs into two fused weight/bias slabs.

    Returns (W_x, b_x, W_h, b_h, fh_pad, fh_k) with
      W_x : (Fin,  3*Fh_pad)    columns ordered [reset | update | candidate]
      W_h : (fh_k, 3*Fh_pad)    fh_k = Fh rounded up to 8 sublanes (K not padded to 128)
      b_x, b_h : (1, 3*Fh_pad)
    Padded rows/columns are zero, which keeps the padded output lanes exactly zero.
    """
    (wrx, brx, wrh, brh, wzx, bzx, wzh, bzh, wnx, bnx, wnh, bnh) = params
    fh_pad = max(_round_up(fh, LANE), LANE)   # output / lane (N) padding
    fh_k = _round_up(fh, SUBLANE)             # contraction (K) padding: sublanes only

    def pad_w(w, rows_to, cols_to):
        r, c = w.shape
        return jnp.pad(w, ((0, rows_to - r), (0, cols_to - c)))

    def pad_b(b, cols_to):
        return jnp.pad(b, ((0, 0), (0, cols_to - b.shape[1])))

    wx = jnp.concatenate([pad_w(wrx, fin, fh_pad),
                          pad_w(wzx, fin, fh_pad),
                          pad_w(wnx, fin, fh_pad)], axis=1)
    wh = jnp.concatenate([pad_w(wrh, fh_k, fh_pad),
                          pad_w(wzh, fh_k, fh_pad),
                          pad_w(wnh, fh_k, fh_pad)], axis=1)
    bx = jnp.concatenate([pad_b(brx, fh_pad),
                          pad_b(bzx, fh_pad),
                          pad_b(bnx, fh_pad)], axis=1)
    bh = jnp.concatenate([pad_b(brh, fh_pad),
                          pad_b(bzh, fh_pad),
                          pad_b(bnh, fh_pad)], axis=1)
    return wx, bx, wh, bh, fh_pad, fh_k


# ---------------------------------------------------------------------------
# Wrappers.
# ---------------------------------------------------------------------------
def equivariant_gru_sequence(x_seq, h0, packed):
    """Run the GRU cell over a sequence in one Pallas call.

    x_seq: (T, B, Fin) f32, h0: (B, Fh) f32  ->  h_seq: (T, B, Fh) f32 (all hidden states).
    """
    wx, bx, wh, bh, fh_pad, fh_k = packed
    T, B, Fin = x_seq.shape
    Fh = h0.shape[1]
    P = fh_pad

    # Pad batch to a sublane multiple (no-op at B=8); padded rows are sliced off at the end.
    Bp = _round_up(B, SUBLANE)
    if Bp != B:
        x_seq = jnp.pad(x_seq, ((0, 0), (0, Bp - B), (0, 0)))
        h0 = jnp.pad(h0, ((0, Bp - B), (0, 0)))

    # Input projection hoisted out of the recurrence: one tall (T*Bp, Fin) matmul, bias folded.
    px_all = (x_seq.reshape(T * Bp, Fin) @ wx + bx).reshape(T, Bp, 3 * P)

    # Pad hidden to 128 lanes once per sequence.
    h0_pad = jnp.pad(h0, ((0, 0), (0, P - Fh)))

    out_pad = pl.pallas_call(
        functools.partial(_gru_seq_kernel, fh_pad=P, fh_k=fh_k),
        out_shape=jax.ShapeDtypeStruct((T, Bp, P), jnp.float32),
        grid=(T,),
        in_specs=[
            pl.BlockSpec((1, Bp, 3 * P), lambda t: (t, 0, 0)),   # per-step px, double-buffered
            pl.BlockSpec((Bp, P), lambda t: (0, 0)),             # h0: DMA'd once, resident
            pl.BlockSpec((fh_k, 3 * P), lambda t: (0, 0)),       # W_h: resident
            pl.BlockSpec((1, 3 * P), lambda t: (0, 0)),          # b_h: resident
        ],
        out_specs=pl.BlockSpec((1, Bp, P), lambda t: (t, 0, 0)),
        scratch_shapes=[pltpu.VMEM((Bp, P), jnp.float32)],       # h carried across grid steps
        compiler_params=pltpu.CompilerParams(
            dimension_semantics=("arbitrary",)),                 # time axis is sequential
    )(px_all, h0_pad, wh, bh)

    return out_pad[:, :B, :Fh]


def equivariant_gru_cell(x, h, packed):
    """Single step of the module's forward: x (B, Fin), h (B, Fh) -> h_new (B, Fh)."""
    return equivariant_gru_sequence(x[None], h, packed)[0]


# ---------------------------------------------------------------------------
# Deterministic equivariant parameter construction + pure-JAX references.
# ---------------------------------------------------------------------------
def make_basis_linear_params(key, channels_in, channels_out, repr_in, repr_out):
    """Deterministic BasisLinear parameters for the C4 cyclic group (permutation repr).

    Equivariant weight blocks are circulant: W_block = sum_r coeffs[r] * shift_r.
    Equivariant bias under permutations is constant per output channel.
    Returns (W, b) laid out for `x @ W + b`:  W: (F_in, F_out),  b: (1, F_out).
    """
    assert repr_in == repr_out
    rank = repr_in
    basis = jnp.stack([jnp.roll(jnp.eye(repr_in, dtype=jnp.float32), r, axis=1)
                       for r in range(rank)])            # (rank, repr_out, repr_in)
    k_w, k_b = jax.random.split(key)
    gain = 1.0 / np.sqrt(channels_in * repr_in)
    coeffs = jax.random.normal(k_w, (channels_out, channels_in, rank), jnp.float32) * gain
    bias_coeffs = jax.random.normal(k_b, (channels_out,), jnp.float32) * 0.1

    W = jnp.einsum("ocr,rpq->ocpq", coeffs, basis)
    W_full = W.transpose(0, 2, 1, 3).reshape(channels_out * repr_out,
                                             channels_in * repr_in)   # (F_out, F_in)
    b_full = jnp.repeat(bias_coeffs, repr_out).reshape(1, channels_out * repr_out)
    return W_full.T, b_full


def gru_ref(x, h, params):
    """Pure-JAX reference of the module's single-step forward (unfused)."""
    (wrx, brx, wrh, brh, wzx, bzx, wzh, bzh, wnx, bnx, wnh, bnh) = params
    r = jax.nn.sigmoid((x @ wrx + brx) + (h @ wrh + brh))
    z = jax.nn.sigmoid((h @ wzh + bzh) + (x @ wzx + bzx))
    n = jnp.tanh((x @ wnx + bnx) + r * (h @ wnh + bnh))
    return (1.0 - z) * n + z * h


def gru_seq_ref(x_seq, h0, params):
    def step(h, x):
        h_new = gru_ref(x, h, params)
        return h_new, h_new
    _, hs = jax.lax.scan(step, h0, x_seq)
    return hs


if __name__ == "__main__":
    # C4 group on both input and hidden representations.
    repr_size = 4
    channels_in = 4
    hidden_channels = 8
    T = 8                               # timesteps driven inside the kernel
    B = 8                               # multiple of 8 sublanes
    Fin = channels_in * repr_size       # 16
    Fh = hidden_channels * repr_size    # 32

    key = jax.random.PRNGKey(0)
    keys = jax.random.split(key, 8)
    wrx, brx = make_basis_linear_params(keys[0], channels_in, hidden_channels, repr_size, repr_size)
    wrh, brh = make_basis_linear_params(keys[1], hidden_channels, hidden_channels, repr_size, repr_size)
    wzx, bzx = make_basis_linear_params(keys[2], channels_in, hidden_channels, repr_size, repr_size)
    wzh, bzh = make_basis_linear_params(keys[3], hidden_channels, hidden_channels, repr_size, repr_size)
    wnx, bnx = make_basis_linear_params(keys[4], channels_in, hidden_channels, repr_size, repr_size)
    wnh, bnh = make_basis_linear_params(keys[5], hidden_channels, hidden_channels, repr_size, repr_size)
    params = (wrx, brx, wrh, brh, wzx, bzx, wzh, bzh, wnx, bnx, wnh, bnh)

    x_seq = jax.random.normal(keys[6], (T, B, Fin), jnp.float32)
    h0 = jax.random.normal(keys[7], (B, Fh), jnp.float32)

    packed = pack_gru_params(params, Fin, Fh)     # parameter-setup glue (done once)

    # Full-sequence kernel vs. scanned pure-JAX reference.
    h_seq = jax.block_until_ready(equivariant_gru_sequence(x_seq, h0, packed))
    h_seq_ref = gru_seq_ref(x_seq, h0, params)
    assert h_seq.shape == (T, B, Fh) and h_seq.dtype == jnp.float32
    np.testing.assert_allclose(np.asarray(h_seq), np.asarray(h_seq_ref), rtol=1e-5, atol=1e-5)

    # Single-step cell (the module's forward) vs. reference.
    h1 = jax.block_until_ready(equivariant_gru_cell(x_seq[0], h0, packed))
    np.testing.assert_allclose(np.asarray(h1), np.asarray(gru_ref(x_seq[0], h0, params)),
                               rtol=1e-5, atol=1e-5)

    print("KERNEL_OK")
</pallas_src>

<mosaic_0001>
module attributes {stable_mosaic.version = 11 : i64} {
  func.func @_gru_seq_kernel(%arg0: i32, %arg1: memref<1x8x384xf32, #tpu.memory_space<vmem>>, %arg2: memref<8x128xf32, #tpu.memory_space<vmem>>, %arg3: memref<32x384xf32, #tpu.memory_space<vmem>>, %arg4: memref<1x384xf32, #tpu.memory_space<vmem>>, %arg5: memref<1x8x128xf32, #tpu.memory_space<vmem>>, %arg6: memref<8x128xf32, #tpu.memory_space<vmem>>) attributes {dimension_semantics = [#tpu.dimension_semantics<arbitrary>], iteration_bounds = array<i64: 8>, scalar_prefetch = 0 : i64, scratch_operands = 1 : i64, tpu.core_type = #tpu.core_type<tc>, window_params = [{transform_indices = @transform_0, window_bounds = array<i64: 1, 8, 384>}, {pipeline_mode = #tpu.pipeline_mode<synchronous>, transform_indices = @transform_1, window_bounds = array<i64: 8, 128>}, {pipeline_mode = #tpu.pipeline_mode<synchronous>, transform_indices = @transform_2, window_bounds = array<i64: 32, 384>}, {pipeline_mode = #tpu.pipeline_mode<synchronous>, transform_indices = @transform_3, window_bounds = array<i64: 1, 384>}, {transform_indices = @transform_4, window_bounds = array<i64: 1, 8, 128>}]} {
    %c0_i32 = arith.constant 0 : i32
    %0 = arith.cmpi eq, %arg0, %c0_i32 : i32
    %1 = arith.extui %0 : i1 to i32
    %c0_i32_0 = arith.constant 0 : i32
    %2 = arith.cmpi ne, %1, %c0_i32_0 : i32
    scf.if %2 {
      %c0_17 = arith.constant 0 : index
      %c0_18 = arith.constant 0 : index
      %42 = vector.load %arg2[%c0_17, %c0_18] : memref<8x128xf32, #tpu.memory_space<vmem>>, vector<8x128xf32>
      %c0_19 = arith.constant 0 : index
      %c0_20 = arith.constant 0 : index
      %43 = vector.load %arg6[%c0_19, %c0_20] : memref<8x128xf32, #tpu.memory_space<vmem>>, vector<8x128xf32>
      tpu.vector_store %arg6[%c0_19, %c0_20], %42 {strides = array<i32>} : memref<8x128xf32, #tpu.memory_space<vmem>>, vector<8x128xf32>,
    } else {
    }
    %c0 = arith.constant 0 : index
    %c0_1 = arith.constant 0 : index
    %3 = vector.load %arg6[%c0, %c0_1] : memref<8x128xf32, #tpu.memory_space<vmem>>, vector<8x128xf32>
    %c0_2 = arith.constant 0 : index
    %c0_3 = arith.constant 0 : index
    %c0_4 = arith.constant 0 : index
    %4 = vector.load %arg1[%c0_2, %c0_3, %c0_4] : memref<1x8x384xf32, #tpu.memory_space<vmem>>, vector<1x8x384xf32>
    %5 = vector.shape_cast %4 : vector<1x8x384xf32> to vector<8x384xf32>
    %6 = vector.extract_strided_slice %3 {offsets = [0, 0], sizes = [8, 32], strides = [1, 1]} : vector<8x128xf32> to vector<8x32xf32>
    %c0_5 = arith.constant 0 : index
    %c0_6 = arith.constant 0 : index
    %7 = vector.load %arg3[%c0_5, %c0_6] : memref<32x384xf32, #tpu.memory_space<vmem>>, vector<32x384xf32>
    %cst = arith.constant dense<0.000000e+00> : vector<8x384xf32>
    %8 = tpu.matmul %6, %7, %cst {dimension_numbers = #tpu.dot_dimension_numbers<[1], [0], [0], [1], [0, 0, 1, 1], [], []>} : vector<8x32xf32>, vector<32x384xf32>, vector<8x384xf32> -> vector<8x384xf32>
    %c0_7 = arith.constant 0 : index
    %c0_8 = arith.constant 0 : index
    %9 = vector.load %arg4[%c0_7, %c0_8] : memref<1x384xf32, #tpu.memory_space<vmem>>, vector<1x384xf32>
    %10 = vector.broadcast %9 : vector<1x384xf32> to vector<8x384xf32>
    %11 = arith.addf %8, %10 : vector<8x384xf32>
    %12 = vector.extract_strided_slice %5 {offsets = [0, 0], sizes = [8, 128], strides = [1, 1]} : vector<8x384xf32> to vector<8x128xf32>
    %13 = vector.extract_strided_slice %11 {offsets = [0, 0], sizes = [8, 128], strides = [1, 1]} : vector<8x384xf32> to vector<8x128xf32>
    %14 = arith.addf %12, %13 : vector<8x128xf32>
    %15 = arith.negf %14 : vector<8x128xf32>
    %16 = math.exp %15 : vector<8x128xf32>
    %cst_9 = arith.constant 1.000000e+00 : f32
    %17 = vector.broadcast %cst_9 : f32 to vector<8x128xf32>
    %18 = arith.addf %17, %16 : vector<8x128xf32>
    %19 = arith.divf %17, %18 : vector<8x128xf32>
    %20 = vector.extract_strided_slice %5 {offsets = [0, 128], sizes = [8, 128], strides = [1, 1]} : vector<8x384xf32> to vector<8x128xf32>
    %21 = vector.extract_strided_slice %11 {offsets = [0, 128], sizes = [8, 128], strides = [1, 1]} : vector<8x384xf32> to vector<8x128xf32>
    %22 = arith.addf %20, %21 : vector<8x128xf32>
    %23 = arith.negf %22 : vector<8x128xf32>
    %24 = math.exp %23 : vector<8x128xf32>
    %cst_10 = arith.constant 1.000000e+00 : f32
    %25 = vector.broadcast %cst_10 : f32 to vector<8x128xf32>
    %26 = arith.addf %25, %24 : vector<8x128xf32>
    %27 = arith.divf %25, %26 : vector<8x128xf32>
    %28 = vector.extract_strided_slice %5 {offsets = [0, 256], sizes = [8, 128], strides = [1, 1]} : vector<8x384xf32> to vector<8x128xf32>
    %29 = vector.extract_strided_slice %11 {offsets = [0, 256], sizes = [8, 128], strides = [1, 1]} : vector<8x384xf32> to vector<8x128xf32>
    %30 = arith.mulf %19, %29 : vector<8x128xf32>
    %31 = arith.addf %28, %30 : vector<8x128xf32>
    %32 = math.tanh %31 : vector<8x128xf32>
    %cst_11 = arith.constant 1.000000e+00 : f32
    %33 = vector.broadcast %cst_11 : f32 to vector<8x128xf32>
    %34 = arith.subf %33, %27 : vector<8x128xf32>
    %35 = arith.mulf %34, %32 : vector<8x128xf32>
    %36 = arith.mulf %27, %3 : vector<8x128xf32>
    %37 = arith.addf %35, %36 : vector<8x128xf32>
    %c0_12 = arith.constant 0 : index
    %c0_13 = arith.constant 0 : index
    %38 = vector.load %arg6[%c0_12, %c0_13] : memref<8x128xf32, #tpu.memory_space<vmem>>, vector<8x128xf32>
    tpu.vector_store %arg6[%c0_12, %c0_13], %37 {strides = array<i32>} : memref<8x128xf32, #tpu.memory_space<vmem>>, vector<8x128xf32>,
    %c0_14 = arith.constant 0 : index
    %c0_15 = arith.constant 0 : index
    %c0_16 = arith.constant 0 : index
    %39 = vector.load %arg5[%c0_14, %c0_15, %c0_16] : memref<1x8x128xf32, #tpu.memory_space<vmem>>, vector<1x8x128xf32>
    %40 = vector.shape_cast %39 : vector<1x8x128xf32> to vector<8x128xf32>
    %41 = vector.shape_cast %37 : vector<8x128xf32> to vector<1x8x128xf32>
    tpu.vector_store %arg5[%c0_14, %c0_15, %c0_16], %41 {strides = array<i32>} : memref<1x8x128xf32, #tpu.memory_space<vmem>>, vector<1x8x128xf32>,
    return
  }
  func.func @transform_0(%arg0: i32) -> (i32, i32, i32) {
    %c0_i32 = arith.constant 0 : i32
    %c0_i32_0 = arith.constant 0 : i32
    %c0_i32_1 = arith.constant 0 : i32
    return %arg0, %c0_i32, %c0_i32_0 : i32, i32, i32
  }
  func.func @transform_1(%arg0: i32) -> (i32, i32) {
    %c0_i32 = arith.constant 0 : i32
    %c0_i32_0 = arith.constant 0 : i32
    %c0_i32_1 = arith.constant 0 : i32
    return %c0_i32, %c0_i32_0 : i32, i32
  }
  func.func @transform_2(%arg0: i32) -> (i32, i32) {
    %c0_i32 = arith.constant 0 : i32
    %c0_i32_0 = arith.constant 0 : i32
    %c0_i32_1 = arith.constant 0 : i32
    return %c0_i32, %c0_i32_0 : i32, i32
  }
  func.func @transform_3(%arg0: i32) -> (i32, i32) {
    %c0_i32 = arith.constant 0 : i32
    %c0_i32_0 = arith.constant 0 : i32
    %c0_i32_1 = arith.constant 0 : i32
    return %c0_i32, %c0_i32_0 : i32, i32
  }
  func.func @transform_4(%arg0: i32) -> (i32, i32, i32) {
    %c0_i32 = arith.constant 0 : i32
    %c0_i32_0 = arith.constant 0 : i32
    %c0_i32_1 = arith.constant 0 : i32
    return %arg0, %c0_i32, %c0_i32_0 : i32, i32, i32
  }
}

</mosaic_0001>

<bundles_post_ra>
// kernel: tpu_custom_call.1
= control target key start
LH: loop header
LB: loop body
LE: loop exit
PB: predicated region body
PF: predicated region fallthrough
CT: control target
= control target key end

     0   :  { %9 = vsyncpa [#allocation4], 0  ;;  %s1035_s0 = inlined_call_operand.hbm [shape: f32[8,8,384], index: 0, kind: input, shape index: {}]   ;;  %s1036_s1 = inlined_call_operand.hbm [shape: f32[8,128], index: 1, kind: input, shape index: {}]   ;;  %s1037_s2 = inlined_call_operand.hbm [shape: f32[32,384], index: 2, kind: input, shape index: {}]   ;;  %s1038_s3 = inlined_call_operand.hbm [shape: f32[1,384], index: 3, kind: input, shape index: {}]   ;;  %s1039_s4 = inlined_call_operand.hbm [shape: f32[8,8,128], index: 4, kind: output, shape index: {}]  }
   0x1   :  { %11 = vsyncpa [#allocation4 + $0x1], 0 }
   0x2   :  { %12 = vsyncpa [#allocation7], 0 }
   0x3   :  { %13 = vsyncpa [#allocation10], 0 }
   0x4   :  { %14 = vsyncpa [#allocation5], 0 }
   0x5   :  { %16 = vsyncpa [#allocation5 + $0x1], 0  ;;  %s860_s15 = smov 0   ;;  %s862_s16 = smov 0  }
   0x6   :  { %s864_s17 = smov 0   ;;  %s866_s18 = smov 0  }
   0x7 LB: > { %s881_s19 = sadd.s32 4294967295, %s828_s18   ;;  %s520_s20 = sadd.s32 4294967294, %s828_s18   ;;  %s828_s18 = sphi %s866_s18, %s1050_s18   ;;  %s824_s17 = sphi %s864_s17, %s1049_s17   ;;  %s820_s16 = sphi %s862_s16, %s1048_s16   ;;  %s816_s15 = sphi %s860_s15, %s1047_s15  }
   0x8   : > { %p42_p0 = scmp.ne.s32.totalorder %s820_s16, %s816_s15  ;;  %p43_p1 = scmp.eq.s32.totalorder %s881_s19, 0 }
   0x9   : > { %p129_p2 = scmp.eq.s32.totalorder %s881_s19, 7  ;;  %p135_p3 = scmp.eq.s32.totalorder %s520_s20, 7 }
   0xa   : > { %p890_p4 = por %p43_p1, %p42_p0  ;;  %p521_p5 = scmp.ge.s32.totalorder %s828_s18, 1 }
   0xb   : > { %p895_p6 = por %p135_p3, %p42_p0  ;;  %p142_p7 = scmp.lt.s32.totalorder %s828_s18, 9 }
   0xc   : > { %s154_s25 = sshll.u32 %s1036_s1, 4  ;;  %s830_s27 = smov [#allocation6]   ;;  %s155_s25 = int_to_ptr.hbm [resolvable:$true] %s154_s25 }
   0xd   : > { %p904_p9 = pnand %p521_p5, %p142_p7  ;;  %s156_s28 = sshll.u32 %s830_s27, 4  ;;  %s157_s28 = int_to_ptr.vmem [resolvable:$true] %s156_s28 }
   0xe   : > { %s165_s5 = sshll.u32 %s1037_s2, 4  ;;  %s831_s7 = smov [#allocation8]   ;;  %s166_s5 = int_to_ptr.hbm [resolvable:$true] %s165_s5 }
   0xf   : > { %p561_p10 = pneg %p904_p9  ;;  %s167_s8 = sshll.u32 %s831_s7, 4  ;;  %s168_s8 = int_to_ptr.vmem [resolvable:$true] %s167_s8 }
  0x10   : > { %s832_s9 = smov 384   ;;  %s833_s10 = smov 24  }
  0x11   : > { %p915_p11 = pnand %p561_p10, %p43_p1  ;;  %s180_s13 = sshll.u32 %s1038_s3, 4  ;;  %s181_s13 = int_to_ptr.hbm [resolvable:$true] %s180_s13 }
  0x12   : > { %s834_s14 = smov [#allocation9]   ;;  %s929_s23 = sadd.s32 1, %s828_s18  }
  0x13   : > { %564 = dma.hbm_to_vmem [thread:$0]  (!%p915_p11), %s155_s25, 128, %s157_s28, [#allocation7]  }
  0x14   : > { %567 = dma.hbm_to_vmem [thread:$0]  (!%p915_p11), %s166_s5, 1536, %s168_s8, [#allocation7], %s832_s9, %s832_s9, %s833_s10  }
  0x15   : > { %s182_s20 = sshll.u32 %s834_s14, 4  ;;  %s26_s24 = ssub.s32 %s828_s18, %s929_s23  ;;  %s183_s20 = int_to_ptr.vmem [resolvable:$true] %s182_s20 }
  0x16   : > { %570 = dma.hbm_to_vmem [thread:$0]  (!%p915_p11), %s181_s13, 48, %s183_s20, [#allocation10]  }
  0x17   : > { %s29_s25 = sadd.s32 1, %s824_s17  ;;  %p27_p12 = scmp.eq.s32.totalorder %s26_s24, 0 }
  0x18   : > { %p36_p13 = scmp.ne.s32.totalorder %s824_s17, %s820_s16  ;;  %p37_p0 = scmp.eq.s32.totalorder %s828_s18, 0 }
  0x19   : > { %p582_p3 = scmp.lt.s32.totalorder %s828_s18, 8  ;;  %s193_s29 = sand.u32 1, %s824_s17  }
  0x1a   : > { %s939_s27 = scalar_select %p27_p12, %s824_s17, %s29_s25  }
  0x1b   : > { %p38_p5 = por %p37_p0, %p36_p13  ;;  %p943_p7 = por %p129_p2, %p36_p13 }
  0x1c   : > { %s543_s30 = smul.u32 24, %s828_s18  ;;  %s194_s13 = scalar_lea.sflag [#allocation4], %s193_s29 }
  0x1d   : > { %s542_s5 = smul.u32 24, %s193_s29  ;;  %p952_p10 = pnand %p582_p3, %p38_p5 }
  0x1e   : > { %s202_s8 = scalar_lea.hbm %s1035_s0, %s543_s30  ;;  %s731_s30 = scalar_lea.hbm %s1035_s0, 192 }
  0x1f   : > { %s204_s10 = sshll.u32 %s202_s8, 4  ;;  %s197_s11 = scalar_lea.vmem [#allocation3], %s542_s5  ;;  %s205_s10 = int_to_ptr.hbm [resolvable:$true] %s204_s10 }
  0x20   : > { %s206_s12 = sshll.u32 %s197_s11, 4  ;;  %s724_s14 = sshra.s32 %s205_s10, 4  ;;  %s207_s12 = int_to_ptr.vmem [resolvable:$true] %s206_s12  ;;  %s725_s14 = int_to_ptr.hbm [resolvable:$true] %s724_s14 }
  0x21   : > { %s726_s20 = scalar_lea.hbm %s725_s14, 24  ;;  %p728_p11 = pneg %p952_p10 }
  0x22   : > { %p727_p2 = scmp.ne.s32.totalorder %s725_s14, %s726_s20  ;;  %p732_p0 = scmp.lt.s32.totalorder %s725_s14, %s1035_s0 }
  0x23   : > { %p733_p3 = scmp.lt.s32.totalorder %s731_s30, %s726_s20 }
  0x24   : > { %p729_p12 = pnand %p728_p11, %p727_p2 }
  0x25   : > { %p734_p5 = por %p733_p3, %p732_p0 }
  0x26   : > { %p730_p13 = pneg %p729_p12 }
  0x28   : > { %p735_p8 = pnand %p734_p5, %p730_p13 }
  0x2a   : > { %738 = shalt.err (!%p735_p8)
}
  0x2b   : > { %574 = dma.hbm_to_vmem [thread:$0]  (!%p952_p10), %s205_s10, 384, %s207_s12, %s194_s13  }
  0x2c   : > { %215 = sbr.rel (%p904_p9) target bundleno = 248 (0xf8), region = 36  ;;  %s969_s29 = sand.u32 (!%p904_p9), 1, %s820_s16  }
  0x2d   : > { %s544_s5 = smul.u32 (!%p904_p9), 24, %s969_s29  ;;  %s218_s8 = scalar_lea.sflag (!%p904_p9), [#allocation4], %s969_s29 }
  0x2f   : > { %s973_s11 = scalar_lea.vmem (!%p904_p9), [#allocation3], %s544_s5 }
  0x31   : > { %799 = dma.done.wait (%p890_p4), %s218_s8, 384  }
  0x32   : > { %801 = vsyncadd (%p890_p4), %s218_s8, 4294966912 }
  0x33   : > { %803 = dma.done.wait (%p43_p1), [#allocation7], 1664  }
  0x34   : > { %805 = vsyncadd (%p43_p1), [#allocation7], 4294965632 }
  0x35   : > { %807 = dma.done.wait (%p43_p1), [#allocation10], 48  }
  0x36   : > { %809 = vsyncadd (%p43_p1), [#allocation10], 4294967248  ;;  %s531_s26 = sshll.u32 %s969_s29, 3  ;;  %p1046_p8 = scmp.ne.s32.totalorder %s881_s19, 0 }
  0x37   : > { %s988_s9 = scalar_lea.vmem [#allocation11], %s531_s26 }
  0x38   : > { %265 = sbr.rel (%p1046_p8) target bundleno = 63 (0x3f), region = 56 }
  0x3d   : > { %v266_v0 = vld [vmem:[#allocation6] sm:$0xff] }
  0x3e   : > { %267 = vst [vmem:[#allocation2] sm:$0xff] %v266_v0 }
  0x3f PF: > { %v281_v1 = vld [vmem:[#allocation8 + $0x48] sm:$0xff]  ;;  %v282_v2 = vld [vmem:[#allocation8 + $0x50] sm:$0xff]  ;;  %v279_v4 = vld [vmem:[#allocation8 + $0x38] sm:$0xff]  ;;  %vm292_vm0 = vcmask 261120   ;;  %s539_s21 = sshll.u32 %s881_s19, 3  ;;  %s418_s14 = sshll.u32 %s988_s9, 4  ;;  %s419_s14 = int_to_ptr.vmem [resolvable:$true] %s418_s14 }
  0x40   : > { %v278_v3 = vld [vmem:[#allocation8 + $0x30] sm:$0xff]  ;;  %308 = vmatpush.msra.mxu0 %v281_v1  ;;  %328 = vmatpush.msra.mxu1 %v282_v2  ;;  %v275_v5 = vld [vmem:[#allocation8 + $0x18] sm:$0xff]  ;;  %v276_v6 = vld [vmem:[#allocation8 + $0x20] sm:$0xff]  ;;  %s416_s13 = scalar_lea.hbm %s1039_s4, %s539_s21  ;;  %s406_s24 = scalar_lea.sflag [#allocation5], %s969_s29 }
  0x41   : > { %v283_v7 = vld [vmem:[#allocation8 + $0x58] sm:$0xff]  ;;  %v280_v8 = vld [vmem:[#allocation8 + $0x40] sm:$0xff]  ;;  %v273_v10 = vld [vmem:[#allocation8 + $0x8] sm:$0xff]  ;;  %s420_s20 = sshll.u32 %s416_s13, 4  ;;  %s774_s7 = scalar_lea.hbm %s1039_s4, 64  ;;  %s421_s20 = int_to_ptr.hbm [resolvable:$true] %s420_s20 }
  0x42   : > { %309 = vmatpush.msra.mxu0 %v278_v3  ;;  %329 = vmatpush.msra.mxu1 %v279_v4  ;;  %v272_v9 = vld [vmem:[#allocation8] sm:$0xff]  ;;  %v277_v12 = vld [vmem:[#allocation8 + $0x28] sm:$0xff]  ;;  %v274_v13 = vld [vmem:[#allocation8 + $0x10] sm:$0xff]  ;;  %s768_s19 = sshra.s32 %s421_s20, 4  ;;  %s769_s19 = int_to_ptr.hbm [resolvable:$true] %s768_s19 }
  0x43   : > { %348 = vmatpush.msra.mxu2 %v283_v7  ;;  %v284_v14 = vld [vmem:[#allocation9] sm:$0x7]  ;;  %v270_v19 = vld [vmem:[%s973_s11 + $0x8] sm:$0xff]  ;;  %v271_v47 = vld [vmem:[%s973_s11 + $0x10] sm:$0xff]  ;;  %s770_s25 = scalar_lea.hbm %s769_s19, 8  ;;  %p775_p10 = scmp.lt.s32.totalorder %s769_s19, %s1039_s4 }
  0x44   : > { %310 = vmatpush.msra.mxu0 %v275_v5  ;;  %330 = vmatpush.msra.mxu1 %v276_v6  ;;  %v286_v15 = vperm.slane %v284_v14, 0  ;;  %v287_v16 = vperm.slane %v284_v14, 1  ;;  %v269_v17 = vld [vmem:[%s973_s11] sm:$0xff]  ;;  %v288_v35 = vperm.slane %v284_v14, 2  ;;  %p771_p1 = scmp.ne.s32.totalorder %s769_s19, %s770_s25  ;;  %p776_p2 = scmp.lt.s32.totalorder %s774_s7, %s770_s25 }
  0x45   : > { %v992_v11 = vld [vmem:[#allocation2] sm:$0xff]  ;;  %349 = vmatpush.msra.mxu2 %v280_v8 }
  0x46   : > { %311 = vmatpush.msra.mxu0 %v272_v9  ;;  %331 = vmatpush.msra.mxu1 %v273_v10  ;;  %p772_p4 = pnand %p771_p1, %p943_p7  ;;  %p777_p11 = por %p776_p2, %p775_p10 }
  0x47   : > { %533 = vmatmul.msk.f32.vlgmr.msra.gmra.mxu0 %vm292_vm0, %v992_v11  ;;  %534 = vmatmul.msk.f32.vlgmr.msra.gmra.mxu1 %vm292_vm0, %v992_v11 }
  0x48   : > { %350 = vmatpush.msra.mxu2 %v277_v12  ;;  %p773_p9 = pneg %p772_p4 }
  0x4a   : > { %351 = vmatpush.msra.mxu2 %v274_v13  ;;  %p778_p12 = pnand %p777_p11, %p773_p9 }
  0x4b   : > { %535 = vmatmul.msk.f32.vlgmr.msra.gmra.mxu2 %vm292_vm0, %v992_v11 }
  0xc4   : > { %v313_v18 = vpop.f32.mrf.mxu0  ;;  %v333_v20 = vpop.f32.mrf.mxu1 }
  0xc5   : > { %v314_v21 = vadd.f32 %v313_v18, %v286_v15  ;;  %v334_v22 = vadd.f32 %v333_v20, %v287_v16 }
  0xc7   : > { %v356_v23 = vadd.f32 %v314_v21, %v269_v17  ;;  %v376_v24 = vadd.f32 %v334_v22, %v270_v19 }
  0xc9   : > { %v536_v25 = vmul.f32 -1.442695, %v356_v23  ;;  %v537_v26 = vmul.f32 -1.442695, %v376_v24 }
  0xcb   : > { %624 = vpow2.f32 %v536_v25 }
  0xcc   : > { %626 = vpow2.f32 %v537_v26 }
  0xce   : > { %v353_v38 = vpop.f32.mrf.mxu2 }
  0xcf   : > { %v354_v43 = vadd.f32 %v353_v38, %v288_v35 }
  0xd1   : > { %v625_v27 = vpop.eup %624 }
  0xd2   : > { %v627_v28 = vpop.eup %626  ;;  %v360_v29 = vadd.f32 1.0, %v625_v27 }
  0xd3   : > { %v380_v30 = vadd.f32 1.0, %v627_v28 }
  0xd4   : > { %628 = vrcp.f32 %v360_v29  ;;  %v372_v39 = vand.u32 2147483648, %v360_v29  ;;  %v370_v41 = vand.u32 2147483647, %v360_v29  ;;  %vm366_vm2 = vweird.f32 %v360_v29 }
  0xd5   : > { %630 = vrcp.f32 %v380_v30  ;;  %vm386_vm5 = vweird.f32 %v380_v30  ;;  %v392_v51 = vand.u32 2147483648, %v380_v30  ;;  %v390_v52 = vand.u32 2147483647, %v380_v30 }
  0xd6   : > { %v373_v45 = vor.u32 1.1754944e-38, %v372_v39  ;;  %vm371_vm4 = vcmp.eq.f32.partialorder %v370_v41, 8.507059e+37 }
  0xd7   : > { %v393_v55 = vor.u32 1.1754944e-38, %v392_v51  ;;  %vm391_vm8 = vcmp.eq.f32.partialorder %v390_v52, 8.507059e+37 }
  0xda   : > { %v629_v31 = vpop.eup %628 }
  0xdb   : > { %v631_v32 = vpop.eup %630  ;;  %v362_v33 = vmul.f32 %v629_v31, %v360_v29  ;;  %vm367_vm1 = vweird.f32 %v629_v31 }
  0xdc   : > { %v382_v34 = vmul.f32 %v631_v32, %v380_v30  ;;  %vm368_vm3 = vmor %vm366_vm2, %vm367_vm1  ;;  %vm387_vm6 = vweird.f32 %v631_v32 }
  0xdd   : > { %v363_v36 = vsub.f32 1.0, %v362_v33  ;;  %vm388_vm7 = vmor %vm386_vm5, %vm387_vm6 }
  0xde   : > { %v383_v37 = vsub.f32 1.0, %v382_v34 }
  0xdf   : > { %v364_v40 = vmul.f32 %v629_v31, %v363_v36 }
  0xe0   : > { %v384_v42 = vmul.f32 %v631_v32, %v383_v37 }
  0xe1   : > { %v365_v44 = vadd.f32 %v629_v31, %v364_v40 }
  0xe2   : > { %v385_v49 = vadd.f32 %v631_v32, %v384_v42 }
  0xe3   : > { %v369_v46 = vsel %vm368_vm3, %v629_v31, %v365_v44 }
  0xe4   : > { %v374_v48 = vsel %vm371_vm4, %v373_v45, %v369_v46  ;;  %v389_v54 = vsel %vm388_vm7, %v631_v32, %v385_v49 }
  0xe5   : > { %v396_v50 = vmul.f32 %v374_v48, %v354_v43  ;;  %v394_v56 = vsel %vm391_vm8, %v393_v55, %v389_v54 }
  0xe6   : > { %v399_v57 = vsub.f32 1.0, %v394_v56  ;;  %v401_v60 = vmul.f32 %v394_v56, %v992_v11 }
  0xe7   : > { %v397_v53 = vadd.f32 %v396_v50, %v271_v47 }
  0xe9   : > { %632 = vtanh.f32 %v397_v53 }
  0xef   : > { %v633_v58 = vpop.eup %632 }
  0xf0   : > { %v400_v59 = vmul.f32 %v633_v58, %v399_v57 }
  0xf2   : > { %v402_v61 = vadd.f32 %v401_v60, %v400_v59 }
  0xf4   : > { %403 = vst [vmem:[#allocation2] sm:$0xff] %v402_v61 }
  0xf5   : > { %404 = vst [vmem:[%s988_s9] sm:$0xff] %v402_v61 }
  0xf6   : > { %781 = shalt.err (!%p778_p12)
}
  0xf7   : > { %559 = dma.vmem_to_hbm [thread:$0]  (%p943_p7), %s419_s14, 128, %s421_s20, %s406_s24  }
  0xf8 PF: > { %p586_p13 = scmp.ge.s32.totalorder %s828_s18, 2  ;;  %s432_s29 = sand.u32 1, %s816_s15  }
  0xf9   : > { %s433_s11 = scalar_lea.sflag [#allocation5], %s432_s29 }
  0xfa   : > { %p576_p0 = pnand %p586_p13, %p895_p6 }
  0xfc   : > { %p577_p3 = pneg %p576_p0 }
  0xfe   : > { %811 = dma.done.wait (%p577_p3), %s433_s11, 128  }
  0xff   : > { %813 = vsyncadd (%p577_p3), %s433_s11, 4294967168  ;;  %p19_p5 = scmp.ge.s32.totalorder %s929_s23, 10   ;;  %s1047_s15 = smov %s820_s16 }
 0x100   : > { %s1048_s16 = smov %s824_s17  ;;  %s1049_s17 = smov %s939_s27 }
 0x101   : > { %s1050_s18 = smov %s929_s23  ;;  %21 = sbr.rel (!%p19_p5) target bundleno = 7 (0x7), region = 97 }
 0x106   :  { %439 = vsyncpa [#allocation4], 1 }
 0x107   :  { %441 = vsyncpa [#allocation4 + $0x1], 1 }
 0x108   :  { %442 = vsyncpa [#allocation7], 1 }
 0x109   :  { %443 = vsyncpa [#allocation10], 1 }
 0x10a   :  { %444 = vsyncpa [#allocation5], 1 }
 0x10b   :  { %446 = vsyncpa [#allocation5 + $0x1], 1 }

</bundles_post_ra>
